<compile_context>
chip_gen: v7x
topology: tpu7x:2x2x1
jax: 0.10.0
libtpu: 0.0.40
codegen_flags: <defaults>
</compile_context>

<pallas_src>
import jax
import jax.numpy as jnp
from jax.experimental import pallas as pl
from jax.experimental.pallas import tpu as pltpu

IN_FEATURES = 28 * 28      # 784
HIDDEN = 64
NUM_CLASSES = 10


def mlp_kernel(x_ref, w1_ref, b1_ref, w2_ref, b2_ref,
               w3_ref, b3_ref, w4_ref, b4_ref, o_ref):
    x = x_ref[...]
    act_dtype = x.dtype           # bf16 streaming keeps layers 2-4 on the fast MXU path

    # fc1 + ReLU   (f32 accumulation on the MXU regardless of stream dtype)
    h = jnp.dot(x, w1_ref[...], preferred_element_type=jnp.float32) + b1_ref[...]
    h = jnp.maximum(h, 0.0).astype(act_dtype)

    # fc2 + ReLU
    h = jnp.dot(h, w2_ref[...], preferred_element_type=jnp.float32) + b2_ref[...]
    h = jnp.maximum(h, 0.0).astype(act_dtype)

    # fc3 + ReLU
    h = jnp.dot(h, w3_ref[...], preferred_element_type=jnp.float32) + b3_ref[...]
    h = jnp.maximum(h, 0.0).astype(act_dtype)

    # fc4 + log_softmax over the 10 classes (done in f32)
    z = jnp.dot(h, w4_ref[...], preferred_element_type=jnp.float32) + b4_ref[...]
    m = jnp.max(z, axis=1, keepdims=True)
    s = z - m
    lse = jnp.log(jnp.sum(jnp.exp(s), axis=1, keepdims=True))
    o_ref[...] = (s - lse).astype(o_ref.dtype)


def net_forward(x, params, *, tile_b=2048, vmem_limit_bytes=None):
    """x: (B, 784) float32 or bfloat16 -> (B, 10) float32 log-probs.

    Weights are expected as (in_features, out_features); biases as
    (1, out_features).  Cast x / weights to bf16 *once* at the call site for
    the halved-HBM / native-MXU path; biases should stay f32.
    """
    (w1, b1), (w2, b2), (w3, b3), (w4, b4) = params
    B = x.shape[0]

    # ---- batch tiling: cdiv grid with a partial trailing block (no padding) --
    tile_b = int(min(int(tile_b), 8 * pl.cdiv(B, 8)))
    tile_b = max(8, (tile_b // 8) * 8)          # sublane-aligned
    grid = (pl.cdiv(B, tile_b),)

    # ---- VMEM budget: double-buffered streams + resident weights + headroom --
    param_bytes = sum(int(a.size) * jnp.dtype(a.dtype).itemsize
                      for layer in params for a in layer)
    if vmem_limit_bytes is None:
        x_item = jnp.dtype(x.dtype).itemsize
        stream = 2 * tile_b * (IN_FEATURES * x_item + NUM_CLASSES * 4)
        scratch = 6 * tile_b * HIDDEN * 4 + (2 << 20)   # f32 intermediates + slack
        # Floor at 32 MiB (fine everywhere), cap at 48 MiB (safe on v7x's 64 MiB).
        vmem_limit_bytes = min(max(stream + param_bytes + scratch, 32 << 20),
                               48 << 20)

    flops = 2 * B * (IN_FEATURES * HIDDEN + 2 * HIDDEN * HIDDEN
                     + HIDDEN * NUM_CLASSES)
    bytes_accessed = (int(x.size) * jnp.dtype(x.dtype).itemsize
                      + param_bytes + B * NUM_CLASSES * 4)

    def const2(i):          # weights/biases: same block every grid step
        return (0, 0)

    out = pl.pallas_call(
        mlp_kernel,
        out_shape=jax.ShapeDtypeStruct((B, NUM_CLASSES), jnp.float32),
        grid=grid,
        in_specs=[
            # x tile: last dim == full 784 (legal; no lane padding in HBM DMA)
            pl.BlockSpec((tile_b, IN_FEATURES), lambda i: (i, 0)),
            pl.BlockSpec(w1.shape, const2), pl.BlockSpec(b1.shape, const2),
            pl.BlockSpec(w2.shape, const2), pl.BlockSpec(b2.shape, const2),
            pl.BlockSpec(w3.shape, const2), pl.BlockSpec(b3.shape, const2),
            pl.BlockSpec(w4.shape, const2), pl.BlockSpec(b4.shape, const2),
        ],
        # direct (tile_b, 10) output: masked vst, but no padded writeback and
        # no separate post-kernel slice copy.
        out_specs=pl.BlockSpec((tile_b, NUM_CLASSES), lambda i: (i, 0)),
        compiler_params=pltpu.CompilerParams(
            dimension_semantics=("parallel",),
            vmem_limit_bytes=int(vmem_limit_bytes)),
        cost_estimate=pl.CostEstimate(
            flops=flops,
            transcendentals=B * (NUM_CLASSES + 1),
            bytes_accessed=bytes_accessed),
    )(x, w1, b1, w2, b2, w3, b3, w4, b4)

    return out


def init_params(key):
    """nn.Linear-style init: U(-1/sqrt(fan_in), +1/sqrt(fan_in)).

    Weights stored as (in_features, out_features); biases as (1, out_features).
    """
    dims = [(IN_FEATURES, HIDDEN), (HIDDEN, HIDDEN),
            (HIDDEN, HIDDEN), (HIDDEN, NUM_CLASSES)]
    params = []
    for i, (fan_in, fan_out) in enumerate(dims):
        kw, kb = jax.random.split(jax.random.fold_in(key, i))
        bound = 1.0 / jnp.sqrt(jnp.float32(fan_in))
        w = jax.random.uniform(kw, (fan_in, fan_out), jnp.float32, -bound, bound)
        b = jax.random.uniform(kb, (1, fan_out), jnp.float32, -bound, bound)
        params.append((w, b))
    return params


def cast_params_for_streaming(params, dtype=jnp.bfloat16):
    """Cast the large operands (weights) once; biases stay f32 (added to f32 acc)."""
    return [(w.astype(dtype), b) for (w, b) in params]


def reference_forward(x, params):
    """Pure-JAX f32 reference for correctness checking."""
    h = x.astype(jnp.float32)
    for i, (w, b) in enumerate(params):
        h = h @ w.astype(jnp.float32) + b.astype(jnp.float32)
        if i < 3:
            h = jnp.maximum(h, 0.0)
    return jax.nn.log_softmax(h, axis=1)


if __name__ == "__main__":
    key = jax.random.PRNGKey(0)
    params = init_params(key)

    # ---- f32 path, single grid step -----------------------------------------
    B = 8
    x = jax.random.normal(jax.random.fold_in(key, 100), (B, IN_FEATURES),
                          jnp.float32)
    out = jax.block_until_ready(net_forward(x, params))
    ref = reference_forward(x, params)
    assert out.shape == (B, NUM_CLASSES)
    assert jnp.allclose(out, ref, atol=2e-5, rtol=2e-5)

    # ---- bf16-streaming path, ragged batch (partial trailing block) ---------
    B2 = 20
    x2 = jax.random.normal(jax.random.fold_in(key, 200), (B2, IN_FEATURES),
                           jnp.float32)
    x2_bf16 = x2.astype(jnp.bfloat16)                       # cast once
    params_bf16 = cast_params_for_streaming(params)         # cast once
    out2 = jax.block_until_ready(net_forward(x2_bf16, params_bf16, tile_b=8))
    ref2 = reference_forward(x2, params)                    # f32 reference
    assert out2.shape == (B2, NUM_CLASSES)
    # bf16 streaming with f32 accumulation: loosened tolerance vs f32 reference.
    assert jnp.allclose(out2, ref2, atol=2e-2, rtol=2e-2)

    print("KERNEL_OK")
</pallas_src>

<mosaic_0001>
module attributes {stable_mosaic.version = 11 : i64} {
  func.func @mlp_kernel(%arg0: i32, %arg1: memref<8x784xf32, #tpu.memory_space<vmem>>, %arg2: memref<784x64xf32, #tpu.memory_space<vmem>>, %arg3: memref<1x64xf32, #tpu.memory_space<vmem>>, %arg4: memref<64x64xf32, #tpu.memory_space<vmem>>, %arg5: memref<1x64xf32, #tpu.memory_space<vmem>>, %arg6: memref<64x64xf32, #tpu.memory_space<vmem>>, %arg7: memref<1x64xf32, #tpu.memory_space<vmem>>, %arg8: memref<64x10xf32, #tpu.memory_space<vmem>>, %arg9: memref<1x10xf32, #tpu.memory_space<vmem>>, %arg10: memref<8x10xf32, #tpu.memory_space<vmem>>) attributes {dimension_semantics = [#tpu.dimension_semantics<parallel>], iteration_bounds = array<i64: 1>, scalar_prefetch = 0 : i64, scratch_operands = 0 : i64, tpu.core_type = #tpu.core_type<tc>, window_params = [{transform_indices = @transform_0, window_bounds = array<i64: 8, 784>}, {pipeline_mode = #tpu.pipeline_mode<synchronous>, transform_indices = @transform_1, window_bounds = array<i64: 784, 64>}, {pipeline_mode = #tpu.pipeline_mode<synchronous>, transform_indices = @transform_2, window_bounds = array<i64: 1, 64>}, {pipeline_mode = #tpu.pipeline_mode<synchronous>, transform_indices = @transform_3, window_bounds = array<i64: 64, 64>}, {pipeline_mode = #tpu.pipeline_mode<synchronous>, transform_indices = @transform_4, window_bounds = array<i64: 1, 64>}, {pipeline_mode = #tpu.pipeline_mode<synchronous>, transform_indices = @transform_5, window_bounds = array<i64: 64, 64>}, {pipeline_mode = #tpu.pipeline_mode<synchronous>, transform_indices = @transform_6, window_bounds = array<i64: 1, 64>}, {pipeline_mode = #tpu.pipeline_mode<synchronous>, transform_indices = @transform_7, window_bounds = array<i64: 64, 10>}, {pipeline_mode = #tpu.pipeline_mode<synchronous>, transform_indices = @transform_8, window_bounds = array<i64: 1, 10>}, {transform_indices = @transform_9, window_bounds = array<i64: 8, 10>}]} {
    %c0 = arith.constant 0 : index
    %c0_0 = arith.constant 0 : index
    %0 = vector.load %arg1[%c0, %c0_0] : memref<8x784xf32, #tpu.memory_space<vmem>>, vector<8x784xf32>
    %c0_1 = arith.constant 0 : index
    %c0_2 = arith.constant 0 : index
    %1 = vector.load %arg2[%c0_1, %c0_2] : memref<784x64xf32, #tpu.memory_space<vmem>>, vector<784x64xf32>
    %cst = arith.constant dense<0.000000e+00> : vector<8x64xf32>
    %2 = tpu.matmul %0, %1, %cst {dimension_numbers = #tpu.dot_dimension_numbers<[1], [0], [0], [1], [0, 0, 1, 1], [], []>} : vector<8x784xf32>, vector<784x64xf32>, vector<8x64xf32> -> vector<8x64xf32>
    %c0_3 = arith.constant 0 : index
    %c0_4 = arith.constant 0 : index
    %3 = vector.load %arg3[%c0_3, %c0_4] : memref<1x64xf32, #tpu.memory_space<vmem>>, vector<1x64xf32>
    %4 = vector.broadcast %3 : vector<1x64xf32> to vector<8x64xf32>
    %5 = arith.addf %2, %4 : vector<8x64xf32>
    %cst_5 = arith.constant 0.000000e+00 : f32
    %6 = vector.broadcast %cst_5 : f32 to vector<8x64xf32>
    %7 = arith.maximumf %5, %6 : vector<8x64xf32>
    %c0_6 = arith.constant 0 : index
    %c0_7 = arith.constant 0 : index
    %8 = vector.load %arg4[%c0_6, %c0_7] : memref<64x64xf32, #tpu.memory_space<vmem>>, vector<64x64xf32>
    %cst_8 = arith.constant dense<0.000000e+00> : vector<8x64xf32>
    %9 = tpu.matmul %7, %8, %cst_8 {dimension_numbers = #tpu.dot_dimension_numbers<[1], [0], [0], [1], [0, 0, 1, 1], [], []>} : vector<8x64xf32>, vector<64x64xf32>, vector<8x64xf32> -> vector<8x64xf32>
    %c0_9 = arith.constant 0 : index
    %c0_10 = arith.constant 0 : index
    %10 = vector.load %arg5[%c0_9, %c0_10] : memref<1x64xf32, #tpu.memory_space<vmem>>, vector<1x64xf32>
    %11 = vector.broadcast %10 : vector<1x64xf32> to vector<8x64xf32>
    %12 = arith.addf %9, %11 : vector<8x64xf32>
    %cst_11 = arith.constant 0.000000e+00 : f32
    %13 = vector.broadcast %cst_11 : f32 to vector<8x64xf32>
    %14 = arith.maximumf %12, %13 : vector<8x64xf32>
    %c0_12 = arith.constant 0 : index
    %c0_13 = arith.constant 0 : index
    %15 = vector.load %arg6[%c0_12, %c0_13] : memref<64x64xf32, #tpu.memory_space<vmem>>, vector<64x64xf32>
    %cst_14 = arith.constant dense<0.000000e+00> : vector<8x64xf32>
    %16 = tpu.matmul %14, %15, %cst_14 {dimension_numbers = #tpu.dot_dimension_numbers<[1], [0], [0], [1], [0, 0, 1, 1], [], []>} : vector<8x64xf32>, vector<64x64xf32>, vector<8x64xf32> -> vector<8x64xf32>
    %c0_15 = arith.constant 0 : index
    %c0_16 = arith.constant 0 : index
    %17 = vector.load %arg7[%c0_15, %c0_16] : memref<1x64xf32, #tpu.memory_space<vmem>>, vector<1x64xf32>
    %18 = vector.broadcast %17 : vector<1x64xf32> to vector<8x64xf32>
    %19 = arith.addf %16, %18 : vector<8x64xf32>
    %cst_17 = arith.constant 0.000000e+00 : f32
    %20 = vector.broadcast %cst_17 : f32 to vector<8x64xf32>
    %21 = arith.maximumf %19, %20 : vector<8x64xf32>
    %c0_18 = arith.constant 0 : index
    %c0_19 = arith.constant 0 : index
    %22 = vector.load %arg8[%c0_18, %c0_19] : memref<64x10xf32, #tpu.memory_space<vmem>>, vector<64x10xf32>
    %cst_20 = arith.constant dense<0.000000e+00> : vector<8x10xf32>
    %23 = tpu.matmul %21, %22, %cst_20 {dimension_numbers = #tpu.dot_dimension_numbers<[1], [0], [0], [1], [0, 0, 1, 1], [], []>} : vector<8x64xf32>, vector<64x10xf32>, vector<8x10xf32> -> vector<8x10xf32>
    %c0_21 = arith.constant 0 : index
    %c0_22 = arith.constant 0 : index
    %24 = vector.load %arg9[%c0_21, %c0_22] : memref<1x10xf32, #tpu.memory_space<vmem>>, vector<1x10xf32>
    %25 = vector.broadcast %24 : vector<1x10xf32> to vector<8x10xf32>
    %26 = arith.addf %23, %25 : vector<8x10xf32>
    %cst_23 = arith.constant dense<0xFF800000> : vector<8xf32>
    %27 = vector.multi_reduction <maximumf>, %26, %cst_23 [1] : vector<8x10xf32> to vector<8xf32>
    %28 = vector.shape_cast %27 : vector<8xf32> to vector<8x1xf32>
    %29 = vector.broadcast %28 : vector<8x1xf32> to vector<8x10xf32>
    %30 = arith.subf %26, %29 : vector<8x10xf32>
    %31 = math.exp %30 : vector<8x10xf32>
    %cst_24 = arith.constant dense<0.000000e+00> : vector<8xf32>
    %32 = vector.multi_reduction <add>, %31, %cst_24 [1] : vector<8x10xf32> to vector<8xf32>
    %33 = vector.shape_cast %32 : vector<8xf32> to vector<8x1xf32>
    %34 = math.log %33 : vector<8x1xf32>
    %35 = vector.broadcast %34 : vector<8x1xf32> to vector<8x10xf32>
    %36 = arith.subf %30, %35 : vector<8x10xf32>
    %c0_25 = arith.constant 0 : index
    %c0_26 = arith.constant 0 : index
    %37 = vector.load %arg10[%c0_25, %c0_26] : memref<8x10xf32, #tpu.memory_space<vmem>>, vector<8x10xf32>
    tpu.vector_store %arg10[%c0_25, %c0_26], %36 {strides = array<i32>} : memref<8x10xf32, #tpu.memory_space<vmem>>, vector<8x10xf32>,
    return
  }
  func.func @transform_0(%arg0: i32) -> (i32, i32) {
    %c0_i32 = arith.constant 0 : i32
    %c0_i32_0 = arith.constant 0 : i32
    return %arg0, %c0_i32 : i32, i32
  }
  func.func @transform_1(%arg0: i32) -> (i32, i32) {
    %c0_i32 = arith.constant 0 : i32
    %c0_i32_0 = arith.constant 0 : i32
    %c0_i32_1 = arith.constant 0 : i32
    return %c0_i32, %c0_i32_0 : i32, i32
  }
  func.func @transform_2(%arg0: i32) -> (i32, i32) {
    %c0_i32 = arith.constant 0 : i32
    %c0_i32_0 = arith.constant 0 : i32
    %c0_i32_1 = arith.constant 0 : i32
    return %c0_i32, %c0_i32_0 : i32, i32
  }
  func.func @transform_3(%arg0: i32) -> (i32, i32) {
    %c0_i32 = arith.constant 0 : i32
    %c0_i32_0 = arith.constant 0 : i32
    %c0_i32_1 = arith.constant 0 : i32
    return %c0_i32, %c0_i32_0 : i32, i32
  }
  func.func @transform_4(%arg0: i32) -> (i32, i32) {
    %c0_i32 = arith.constant 0 : i32
    %c0_i32_0 = arith.constant 0 : i32
    %c0_i32_1 = arith.constant 0 : i32
    return %c0_i32, %c0_i32_0 : i32, i32
  }
  func.func @transform_5(%arg0: i32) -> (i32, i32) {
    %c0_i32 = arith.constant 0 : i32
    %c0_i32_0 = arith.constant 0 : i32
    %c0_i32_1 = arith.constant 0 : i32
    return %c0_i32, %c0_i32_0 : i32, i32
  }
  func.func @transform_6(%arg0: i32) -> (i32, i32) {
    %c0_i32 = arith.constant 0 : i32
    %c0_i32_0 = arith.constant 0 : i32
    %c0_i32_1 = arith.constant 0 : i32
    return %c0_i32, %c0_i32_0 : i32, i32
  }
  func.func @transform_7(%arg0: i32) -> (i32, i32) {
    %c0_i32 = arith.constant 0 : i32
    %c0_i32_0 = arith.constant 0 : i32
    %c0_i32_1 = arith.constant 0 : i32
    return %c0_i32, %c0_i32_0 : i32, i32
  }
  func.func @transform_8(%arg0: i32) -> (i32, i32) {
    %c0_i32 = arith.constant 0 : i32
    %c0_i32_0 = arith.constant 0 : i32
    %c0_i32_1 = arith.constant 0 : i32
    return %c0_i32, %c0_i32_0 : i32, i32
  }
  func.func @transform_9(%arg0: i32) -> (i32, i32) {
    %c0_i32 = arith.constant 0 : i32
    %c0_i32_0 = arith.constant 0 : i32
    return %arg0, %c0_i32 : i32, i32
  }
}

</mosaic_0001>

<bundles_post_ra>
// kernel: tpu_custom_call.1
= control target key start
LH: loop header
LB: loop body
LE: loop exit
PB: predicated region body
PF: predicated region fallthrough
CT: control target
= control target key end

     0   :  { %s1591_s0 = inlined_call_operand.vmem [shape: f32[8,784], index: 0, kind: input, shape index: {}]   ;;  %s1592_s1 = inlined_call_operand.vmem [shape: f32[784,64], index: 1, kind: input, shape index: {}]   ;;  %s1593_s2 = inlined_call_operand.vmem [shape: f32[1,64], index: 2, kind: input, shape index: {}]   ;;  %s1594_s3 = inlined_call_operand.vmem [shape: f32[64,64], index: 3, kind: input, shape index: {}]   ;;  %s1595_s4 = inlined_call_operand.vmem [shape: f32[1,64], index: 4, kind: input, shape index: {}]   ;;  %s1596_s5 = inlined_call_operand.vmem [shape: f32[64,64], index: 5, kind: input, shape index: {}]   ;;  %s1597_s6 = inlined_call_operand.vmem [shape: f32[1,64], index: 6, kind: input, shape index: {}]   ;;  %s1598_s7 = inlined_call_operand.vmem [shape: f32[64,10], index: 7, kind: input, shape index: {}]   ;;  %s1599_s8 = inlined_call_operand.vmem [shape: f32[1,10], index: 8, kind: input, shape index: {}]   ;;  %s1600_s9 = inlined_call_operand.hbm [shape: f32[8,10], index: 9, kind: output, shape index: {}]  }
   0x1   :  { %v56_v0 = vld [vmem:[%s1592_s1 + $0x80] sm:$0xff]  ;;  %v57_v1 = vld [vmem:[%s1592_s1 + $0x88] sm:$0xff]  ;;  %v58_v11 = vld [vmem:[%s1592_s1 + $0x90] sm:$0xff] }
   0x2   :  { %v40_v2 = vld [vmem:[%s1592_s1] sm:$0xff]  ;;  %v932_v3 = vpack.c.bf16 %v57_v1, %v56_v0  ;;  %v41_v4 = vld [vmem:[%s1592_s1 + $0x8] sm:$0xff]  ;;  %v59_v13 = vld [vmem:[%s1592_s1 + $0x98] sm:$0xff] }
   0x3   :  { %v88_v5 = vld [vmem:[%s1592_s1 + $0x180] sm:$0xff]  ;;  %v89_v6 = vld [vmem:[%s1592_s1 + $0x188] sm:$0xff]  ;;  %v934_v7 = vpack.c.bf16 %v41_v4, %v40_v2  ;;  %v42_v14 = vld [vmem:[%s1592_s1 + $0x10] sm:$0xff]  ;;  %v936_v16 = vpack.c.bf16 %v59_v13, %v58_v11 }
   0x4   :  { %v964_v8 = vpack.c.bf16 %v89_v6, %v88_v5  ;;  %v72_v9 = vld [vmem:[%s1592_s1 + $0x100] sm:$0xff]  ;;  %v73_v10 = vld [vmem:[%s1592_s1 + $0x108] sm:$0xff]  ;;  %933 = vmatprep.subr.bf16.mxu0 %v932_v3  ;;  %v43_v15 = vld [vmem:[%s1592_s1 + $0x18] sm:$0xff] }
   0x5   :  { %v966_v12 = vpack.c.bf16 %v73_v10, %v72_v9  ;;  %935 = vmatpush3.bf16.msra.mxu0 %v934_v7  ;;  %v938_v17 = vpack.c.bf16 %v43_v15, %v42_v14  ;;  %v90_v18 = vld [vmem:[%s1592_s1 + $0x190] sm:$0xff]  ;;  %v91_v19 = vld [vmem:[%s1592_s1 + $0x198] sm:$0xff]  ;;  %v60_v23 = vld [vmem:[%s1592_s1 + $0xa0] sm:$0xff] }
   0x6   :  { %965 = vmatprep.subr.bf16.mxu1 %v964_v8  ;;  %v74_v20 = vld [vmem:[%s1592_s1 + $0x110] sm:$0xff]  ;;  %v968_v21 = vpack.c.bf16 %v91_v19, %v90_v18  ;;  %v75_v22 = vld [vmem:[%s1592_s1 + $0x118] sm:$0xff]  ;;  %v61_v24 = vld [vmem:[%s1592_s1 + $0xa8] sm:$0xff]  ;;  %937 = vmatprep.subr.bf16.mxu0 %v936_v16 }
   0x7   :  { %967 = vmatpush3.bf16.msra.mxu1 %v966_v12  ;;  %v970_v25 = vpack.c.bf16 %v75_v22, %v74_v20  ;;  %v940_v26 = vpack.c.bf16 %v61_v24, %v60_v23  ;;  %v44_v27 = vld [vmem:[%s1592_s1 + $0x20] sm:$0xff]  ;;  %v45_v28 = vld [vmem:[%s1592_s1 + $0x28] sm:$0xff]  ;;  %v62_v35 = vld [vmem:[%s1592_s1 + $0xb0] sm:$0xff] }
   0x8   :  { %v92_v29 = vld [vmem:[%s1592_s1 + $0x1a0] sm:$0xff]  ;;  %969 = vmatprep.subr.bf16.mxu1 %v968_v21  ;;  %v93_v30 = vld [vmem:[%s1592_s1 + $0x1a8] sm:$0xff]  ;;  %v942_v33 = vpack.c.bf16 %v45_v28, %v44_v27  ;;  %v63_v36 = vld [vmem:[%s1592_s1 + $0xb8] sm:$0xff] }
   0x9   :  { %v76_v31 = vld [vmem:[%s1592_s1 + $0x120] sm:$0xff]  ;;  %v77_v32 = vld [vmem:[%s1592_s1 + $0x128] sm:$0xff]  ;;  %939 = vmatpush3.bf16.msra.mxu0 %v938_v17  ;;  %v972_v34 = vpack.c.bf16 %v93_v30, %v92_v29  ;;  %v46_v37 = vld [vmem:[%s1592_s1 + $0x30] sm:$0xff]  ;;  %v944_v39 = vpack.c.bf16 %v63_v36, %v62_v35 }
   0xa   :  { %941 = vmatprep.subr.bf16.mxu0 %v940_v26  ;;  %v974_v38 = vpack.c.bf16 %v77_v32, %v76_v31  ;;  %v47_v40 = vld [vmem:[%s1592_s1 + $0x38] sm:$0xff]  ;;  %v94_v41 = vld [vmem:[%s1592_s1 + $0x1b0] sm:$0xff]  ;;  %v64_v46 = vld [vmem:[%s1592_s1 + $0xc0] sm:$0xff] }
   0xb   :  { %971 = vmatpush3.bf16.msra.mxu1 %v970_v25  ;;  %v95_v42 = vld [vmem:[%s1592_s1 + $0x1b8] sm:$0xff]  ;;  %v78_v44 = vld [vmem:[%s1592_s1 + $0x130] sm:$0xff]  ;;  %v65_v47 = vld [vmem:[%s1592_s1 + $0xc8] sm:$0xff]  ;;  %v946_v48 = vpack.c.bf16 %v47_v40, %v46_v37 }
   0xc   :  { %973 = vmatprep.subr.bf16.mxu1 %v972_v34  ;;  %v976_v43 = vpack.c.bf16 %v95_v42, %v94_v41  ;;  %v79_v45 = vld [vmem:[%s1592_s1 + $0x138] sm:$0xff]  ;;  %v96_v49 = vld [vmem:[%s1592_s1 + $0x1c0] sm:$0xff]  ;;  %v97_v50 = vld [vmem:[%s1592_s1 + $0x1c8] sm:$0xff]  ;;  %v948_v52 = vpack.c.bf16 %v65_v47, %v64_v46 }
   0xd   :  { %943 = vmatpush3.bf16.msra.mxu0 %v942_v33  ;;  %v978_v51 = vpack.c.bf16 %v79_v45, %v78_v44  ;;  %v48_v53 = vld [vmem:[%s1592_s1 + $0x40] sm:$0xff]  ;;  %v49_v54 = vld [vmem:[%s1592_s1 + $0x48] sm:$0xff]  ;;  %v980_v56 = vpack.c.bf16 %v97_v50, %v96_v49  ;;  %v66_v58 = vld [vmem:[%s1592_s1 + $0xd0] sm:$0xff]  ;;  %v1099_v50 = vmov 0.0|0.0  }
   0xe   :  { %945 = vmatprep.subr.bf16.mxu0 %v944_v39  ;;  %v80_v55 = vld [vmem:[%s1592_s1 + $0x140] sm:$0xff]  ;;  %v81_v57 = vld [vmem:[%s1592_s1 + $0x148] sm:$0xff]  ;;  %v67_v59 = vld [vmem:[%s1592_s1 + $0xd8] sm:$0xff]  ;;  %v950_v62 = vpack.c.bf16 %v49_v54, %v48_v53 }
   0xf   :  { %975 = vmatpush3.bf16.msra.mxu1 %v974_v38  ;;  %v98_v60 = vld [vmem:[%s1592_s1 + $0x1d0] sm:$0xff]  ;;  %v99_v61 = vld [vmem:[%s1592_s1 + $0x1d8] sm:$0xff]  ;;  %v982_v63 = vpack.c.bf16 %v81_v57, %v80_v55  ;;  %v952_v0 = vpack.c.bf16 %v67_v59, %v66_v58  ;;  %v68_v6 = vld [vmem:[%s1592_s1 + $0xe0] sm:$0xff] }
  0x10   :  { %977 = vmatprep.subr.bf16.mxu1 %v976_v43  ;;  %v50_v1 = vld [vmem:[%s1592_s1 + $0x50] sm:$0xff]  ;;  %v51_v2 = vld [vmem:[%s1592_s1 + $0x58] sm:$0xff]  ;;  %v984_v4 = vpack.c.bf16 %v99_v61, %v98_v60  ;;  %v69_v7 = vld [vmem:[%s1592_s1 + $0xe8] sm:$0xff] }
  0x11   :  { %947 = vmatpush3.bf16.msra.mxu0 %v946_v48  ;;  %v82_v3 = vld [vmem:[%s1592_s1 + $0x150] sm:$0xff]  ;;  %v83_v5 = vld [vmem:[%s1592_s1 + $0x158] sm:$0xff]  ;;  %v100_v8 = vld [vmem:[%s1592_s1 + $0x1e0] sm:$0xff]  ;;  %v954_v10 = vpack.c.bf16 %v51_v2, %v50_v1  ;;  %v956_v14 = vpack.c.bf16 %v69_v7, %v68_v6 }
  0x12   :  { %949 = vmatprep.subr.bf16.mxu0 %v948_v52  ;;  %v101_v9 = vld [vmem:[%s1592_s1 + $0x1e8] sm:$0xff]  ;;  %v52_v11 = vld [vmem:[%s1592_s1 + $0x60] sm:$0xff]  ;;  %v986_v13 = vpack.c.bf16 %v83_v5, %v82_v3  ;;  %v70_v19 = vld [vmem:[%s1592_s1 + $0xf0] sm:$0xff] }
  0x13   :  { %979 = vmatpush3.bf16.msra.mxu1 %v978_v51  ;;  %v34_v12 = vld [vmem:[%s1591_s0 + $0x8] sm:$0xff]  ;;  %v84_v16 = vld [vmem:[%s1592_s1 + $0x160] sm:$0xff]  ;;  %v988_v18 = vpack.c.bf16 %v101_v9, %v100_v8  ;;  %v71_v20 = vld [vmem:[%s1592_s1 + $0xf8] sm:$0xff] }
  0x14   :  { %981 = vmatprep.subr.bf16.mxu1 %v980_v56  ;;  %v53_v15 = vld [vmem:[%s1592_s1 + $0x68] sm:$0xff]  ;;  %213 = vmatprep.mubr.f32.mxu0 %v34_v12  ;;  %v36_v21 = vld [vmem:[%s1591_s0 + $0x18] sm:$0xff]  ;;  %v102_v22 = vld [vmem:[%s1592_s1 + $0x1f0] sm:$0xff]  ;;  %v960_v26 = vpack.c.bf16 %v71_v20, %v70_v19 }
  0x15   :  { %951 = vmatpush3.bf16.msra.mxu0 %v950_v62  ;;  %v85_v17 = vld [vmem:[%s1592_s1 + $0x168] sm:$0xff]  ;;  %v103_v23 = vld [vmem:[%s1592_s1 + $0x1f8] sm:$0xff]  ;;  %283 = vmatprep.mubr.f32.mxu1 %v36_v21  ;;  %v958_v24 = vpack.c.bf16 %v53_v15, %v52_v11  ;;  %v54_v27 = vld [vmem:[%s1592_s1 + $0x70] sm:$0xff] }
  0x16   :  { %953 = vmatprep.subr.bf16.mxu0 %v952_v0  ;;  %v990_v25 = vpack.c.bf16 %v85_v17, %v84_v16  ;;  %v55_v28 = vld [vmem:[%s1592_s1 + $0x78] sm:$0xff]  ;;  %v86_v29 = vld [vmem:[%s1592_s1 + $0x170] sm:$0xff]  ;;  %v992_v30 = vpack.c.bf16 %v103_v23, %v102_v22  ;;  %v120_v32 = vld [vmem:[%s1592_s1 + $0x280] sm:$0xff] }
  0x17   :  { %983 = vmatpush3.bf16.msra.mxu1 %v982_v63  ;;  %v87_v31 = vld [vmem:[%s1592_s1 + $0x178] sm:$0xff]  ;;  %v121_v33 = vld [vmem:[%s1592_s1 + $0x288] sm:$0xff]  ;;  %v962_v34 = vpack.c.bf16 %v55_v28, %v54_v27  ;;  %v104_v37 = vld [vmem:[%s1592_s1 + $0x200] sm:$0xff] }
  0x18   :  { %985 = vmatprep.subr.bf16.mxu1 %v984_v4  ;;  %v994_v35 = vpack.c.bf16 %v87_v31, %v86_v29  ;;  %v996_v36 = vpack.c.bf16 %v121_v33, %v120_v32  ;;  %v105_v38 = vld [vmem:[%s1592_s1 + $0x208] sm:$0xff]  ;;  %v122_v39 = vld [vmem:[%s1592_s1 + $0x290] sm:$0xff]  ;;  %v123_v40 = vld [vmem:[%s1592_s1 + $0x298] sm:$0xff] }
  0x19   :  { %955 = vmatpush3.bf16.msra.mxu0 %v954_v10  ;;  %v33_v41 = vld [vmem:[%s1591_s0] sm:$0xff]  ;;  %v998_v42 = vpack.c.bf16 %v105_v38, %v104_v37  ;;  %v35_v43 = vld [vmem:[%s1591_s0 + $0x10] sm:$0xff]  ;;  %v1000_v45 = vpack.c.bf16 %v123_v40, %v122_v39  ;;  %v107_v46 = vld [vmem:[%s1592_s1 + $0x218] sm:$0xff] }
  0x1a   :  { %957 = vmatprep.subr.bf16.mxu0 %v956_v14  ;;  %v106_v44 = vld [vmem:[%s1592_s1 + $0x210] sm:$0xff]  ;;  %v124_v47 = vld [vmem:[%s1592_s1 + $0x2a0] sm:$0xff]  ;;  %v125_v48 = vld [vmem:[%s1592_s1 + $0x2a8] sm:$0xff] }
  0x1b   :  { %987 = vmatpush3.bf16.msra.mxu1 %v986_v13  ;;  %v38_v49 = vld [vmem:[%s1591_s0 + $0x28] sm:$0xff]  ;;  %v136_v51 = vld [vmem:[%s1592_s1 + $0x300] sm:$0xff] }
  0x1c   :  { %989 = vmatprep.subr.bf16.mxu1 %v988_v18  ;;  %v137_v52 = vld [vmem:[%s1592_s1 + $0x308] sm:$0xff] }
  0x1d   :  { %959 = vmatpush3.bf16.msra.mxu0 %v958_v24  ;;  %v1029_v53 = vpack.c.bf16 %v137_v52, %v136_v51 }
  0x1e   :  { %961 = vmatprep.subr.bf16.mxu0 %v960_v26 }
  0x1f   :  { %991 = vmatpush3.bf16.msra.mxu1 %v990_v25 }
  0x20   :  { %993 = vmatprep.subr.bf16.mxu1 %v992_v30 }
  0x21   :  { %963 = vmatpush3.bf16.msra.mxu0 %v962_v34 }
  0x22   :  { %997 = vmatprep.subr.bf16.mxu0 %v996_v36 }
  0x23   :  { %995 = vmatpush3.bf16.msra.mxu1 %v994_v35 }
  0x24   :  { %1028 = vmatprep.subr.bf16.mxu1 %v1099_v50  ;;  %214 = vmatmul.mubr.f32.vlgmr.msra.gmra.mrb[0].mxu0 %v33_v41 }
  0x25   :  { %14 = vsyncpa [#allocation3], 0  ;;  %999 = vmatpush3.bf16.msra.mxu0 %v998_v42  ;;  %v1002_v54 = vpack.c.bf16 %v107_v46, %v106_v44  ;;  %v1004_v55 = vpack.c.bf16 %v125_v48, %v124_v47  ;;  %v108_v56 = vld [vmem:[%s1592_s1 + $0x220] sm:$0xff]  ;;  %v109_v57 = vld [vmem:[%s1592_s1 + $0x228] sm:$0xff]  ;;  %353 = vmatprep.mubr.f32.mxu0 %v38_v49  ;;  %vm1100_vm0 = vmmov 0   ;;  %v1101_v60 = vmov 0.0  }
  0x26   :  { %284 = vmatmul.mubr.f32.vlgmr.msra.gmra.mrb[0].mxu1 %v35_v43  ;;  %1001 = vmatprep.subr.bf16.mxu0 %v1000_v45  ;;  %v126_v58 = vld [vmem:[%s1592_s1 + $0x2b0] sm:$0xff]  ;;  %v127_v59 = vld [vmem:[%s1592_s1 + $0x2b8] sm:$0xff]  ;;  %vm145_vm1 = vcmask 130048   ;;  %v1006_v62 = vpack.c.bf16 %v109_v57, %v108_v56  ;;  %v128_v2 = vld [vmem:[%s1592_s1 + $0x2c0] sm:$0xff]  ;;  %vm445_vm2 = vcmask 523264   ;;  %vm697_vm3 = vcmask 80896  }
  0x27   :  { %1030 = vmatpush3.bf16.msra.mxu1 %v1029_v53  ;;  %872 = vmatprep.mubr.msk.f32.mxu1 %vm1100_vm0, %v1101_v60  ;;  %v39_v61 = vld [vmem:[%s1591_s0 + $0x30] sm:$0xff]  ;;  %v1008_v63 = vpack.c.bf16 %v127_v59, %v126_v58  ;;  %v111_v1 = vld [vmem:[%s1592_s1 + $0x238] sm:$0xff]  ;;  %v129_v3 = vld [vmem:[%s1592_s1 + $0x2c8] sm:$0xff] }
  0x28   :  { %1031 = vmatprep.subr.bf16.mxu1 %v1099_v50  ;;  %v110_v0 = vld [vmem:[%s1592_s1 + $0x230] sm:$0xff]  ;;  %v1012_v5 = vpack.c.bf16 %v129_v3, %v128_v2  ;;  %v112_v6 = vld [vmem:[%s1592_s1 + $0x240] sm:$0xff]  ;;  %v113_v7 = vld [vmem:[%s1592_s1 + $0x248] sm:$0xff] }
  0x29   :  { %1003 = vmatpush3.bf16.msra.mxu0 %v1002_v54  ;;  %v1010_v4 = vpack.c.bf16 %v111_v1, %v110_v0  ;;  %v130_v8 = vld [vmem:[%s1592_s1 + $0x2d0] sm:$0xff]  ;;  %v131_v9 = vld [vmem:[%s1592_s1 + $0x2d8] sm:$0xff]  ;;  %v1014_v10 = vpack.c.bf16 %v113_v7, %v112_v6  ;;  %v132_v14 = vld [vmem:[%s1592_s1 + $0x2e0] sm:$0xff] }
  0x2a   :  { %1005 = vmatprep.subr.bf16.mxu0 %v1004_v55  ;;  %873 = vmatmul.mubr.msk.f32.vlgmr.msra.gmra.mrb[2].mxu1 %vm145_vm1, %v39_v61  ;;  %v1016_v11 = vpack.c.bf16 %v131_v9, %v130_v8  ;;  %v114_v12 = vld [vmem:[%s1592_s1 + $0x250] sm:$0xff]  ;;  %v115_v13 = vld [vmem:[%s1592_s1 + $0x258] sm:$0xff]  ;;  %v133_v15 = vld [vmem:[%s1592_s1 + $0x2e8] sm:$0xff] }
  0x2b   :  { %891 = vmatprep.mubr.msk.f32.mxu1 %vm1100_vm0, %v1101_v60  ;;  %v1018_v16 = vpack.c.bf16 %v115_v13, %v114_v12  ;;  %v1020_v17 = vpack.c.bf16 %v133_v15, %v132_v14  ;;  %v116_v18 = vld [vmem:[%s1592_s1 + $0x260] sm:$0xff]  ;;  %v117_v19 = vld [vmem:[%s1592_s1 + $0x268] sm:$0xff]  ;;  %v134_v20 = vld [vmem:[%s1592_s1 + $0x2f0] sm:$0xff] }
  0x2c   :  { %v135_v21 = vld [vmem:[%s1592_s1 + $0x2f8] sm:$0xff]  ;;  %v1022_v22 = vpack.c.bf16 %v117_v19, %v116_v18  ;;  %v118_v24 = vld [vmem:[%s1592_s1 + $0x270] sm:$0xff]  ;;  %v37_v27 = vld [vmem:[%s1591_s0 + $0x20] sm:$0xff] }
  0x2d   :  { %1007 = vmatpush3.bf16.msra.mxu0 %v1006_v62  ;;  %v1024_v23 = vpack.c.bf16 %v135_v21, %v134_v20  ;;  %v119_v25 = vld [vmem:[%s1592_s1 + $0x278] sm:$0xff]  ;;  %v430_v28 = vld [vmem:[%s1594_s3] sm:$0xff]  ;;  %v431_v29 = vld [vmem:[%s1594_s3 + $0x8] sm:$0xff] }
  0x2e   :  { %1009 = vmatprep.subr.bf16.mxu0 %v1008_v63  ;;  %v1026_v26 = vpack.c.bf16 %v119_v25, %v118_v24  ;;  %v432_v30 = vld [vmem:[%s1594_s3 + $0x10] sm:$0xff]  ;;  %v1032_v31 = vpack.c.bf16 %v431_v29, %v430_v28  ;;  %v433_v32 = vld [vmem:[%s1594_s3 + $0x18] sm:$0xff]  ;;  %v434_v34 = vld [vmem:[%s1594_s3 + $0x20] sm:$0xff] }
  0x2f   :  { %v1035_v33 = vpack.c.bf16 %v433_v32, %v432_v30  ;;  %v435_v35 = vld [vmem:[%s1594_s3 + $0x28] sm:$0xff]  ;;  %v436_v37 = vld [vmem:[%s1594_s3 + $0x30] sm:$0xff]  ;;  %v437_v38 = vld [vmem:[%s1594_s3 + $0x38] sm:$0xff] }
  0x30   :  { %1033 = vmatpush3.bf16.msra.mxu1 %v1032_v31  ;;  %v1038_v36 = vpack.c.bf16 %v435_v35, %v434_v34  ;;  %v1041_v39 = vpack.c.bf16 %v437_v38, %v436_v37  ;;  %v725_v41 = vld [vmem:[%s1593_s2] ss:$0 sm:$0xff]  ;;  %v521_v57 = vld [vmem:[%s1596_s5 + $0x8] sm:$0xff]  ;;  %v522_v62 = vld [vmem:[%s1596_s5 + $0x10] sm:$0xff] }
  0x31   :  { %1011 = vmatpush3.bf16.msra.mxu0 %v1010_v4  ;;  %1034 = vmatprep.subr.bf16.mxu1 %v1099_v50  ;;  %v520_v56 = vld [vmem:[%s1596_s5] sm:$0xff]  ;;  %v523_v63 = vld [vmem:[%s1596_s5 + $0x18] sm:$0xff]  ;;  %v525_v2 = vld [vmem:[%s1596_s5 + $0x28] sm:$0xff] }
  0x32   :  { %1013 = vmatprep.subr.bf16.mxu0 %v1012_v5  ;;  %v1044_v59 = vpack.c.bf16 %v521_v57, %v520_v56  ;;  %v1047_v0 = vpack.c.bf16 %v523_v63, %v522_v62  ;;  %v524_v1 = vld [vmem:[%s1596_s5 + $0x20] sm:$0xff]  ;;  %v527_v4 = vld [vmem:[%s1596_s5 + $0x38] sm:$0xff]  ;;  %v610_v7 = vld [vmem:[%s1598_s7 + $0x8] sm:$0xff] }
  0x33   :  { %v1050_v3 = vpack.c.bf16 %v525_v2, %v524_v1  ;;  %v609_v6 = vld [vmem:[%s1598_s7] sm:$0xff]  ;;  %v611_v8 = vld [vmem:[%s1598_s7 + $0x10] sm:$0xff]  ;;  %v614_v13 = vld [vmem:[%s1598_s7 + $0x28] sm:$0xff] }
  0x34   :  { %1036 = vmatpush3.bf16.msra.mxu1 %v1035_v33  ;;  %v1056_v9 = vpack.c.bf16 %v610_v7, %v609_v6  ;;  %v613_v12 = vld [vmem:[%s1598_s7 + $0x20] sm:$0xff]  ;;  %v615_v20 = vld [vmem:[%s1598_s7 + $0x30] sm:$0xff]  ;;  %v616_v21 = vld [vmem:[%s1598_s7 + $0x38] sm:$0xff] }
  0x35   :  { %1015 = vmatpush3.bf16.msra.mxu0 %v1014_v10  ;;  %1037 = vmatprep.subr.bf16.mxu1 %v1099_v50  ;;  %v612_v10 = vld [vmem:[%s1598_s7 + $0x18] sm:$0xff]  ;;  %v1062_v14 = vpack.c.bf16 %v614_v13, %v613_v12  ;;  %v727_v15 = vld [vmem:[%s1595_s4] ss:$0 sm:$0xff] }
  0x36   :  { %1017 = vmatprep.subr.bf16.mxu0 %v1016_v11  ;;  %v1059_v11 = vpack.c.bf16 %v612_v10, %v611_v8 }
  0x38   :  { %1039 = vmatpush3.bf16.msra.mxu1 %v1038_v36 }
  0x39   :  { %1019 = vmatpush3.bf16.msra.mxu0 %v1018_v16  ;;  %1040 = vmatprep.subr.bf16.mxu1 %v1099_v50 }
  0x3a   :  { %1021 = vmatprep.subr.bf16.mxu0 %v1020_v17 }
  0x3c   :  { %1042 = vmatpush3.bf16.msra.mxu1 %v1041_v39 }
  0x3d   :  { %1023 = vmatpush3.bf16.msra.mxu0 %v1022_v22  ;;  %1043 = vmatprep.subr.bf16.mxu1 %v1099_v50  ;;  %v1065_v22 = vpack.c.bf16 %v616_v21, %v615_v20 }
  0x3e   :  { %1025 = vmatprep.subr.bf16.mxu0 %v1024_v23 }
  0x41   :  { %1027 = vmatpush3.bf16.msra.mxu0 %v1026_v26 }
  0x42   :  { %1055 = vmatprep.subr.bf16.mxu0 %v1099_v50 }
  0x44   :  { %354 = vmatmul.mubr.f32.vlgmr.msra.gmra.mrb[2].mxu0 %v37_v27  ;;  %v731_v27 = vld [vmem:[%s1599_s8] ss:$0 sm:$0xff] }
  0x45   :  { %929 = vmatprep.mubr.msk.f32.mxu0 %vm1100_vm0, %v1101_v60  ;;  %1057 = vmatpush3.bf16.msra.mxu0 %v1056_v9 }
  0x46   :  { %1058 = vmatprep.subr.bf16.mxu0 %v1099_v50 }
  0x49   :  { %1060 = vmatpush3.bf16.msra.mxu0 %v1059_v11 }
  0x4a   :  { %1061 = vmatprep.subr.bf16.mxu0 %v1099_v50 }
  0x4d   :  { %1063 = vmatpush3.bf16.msra.mxu0 %v1062_v14 }
  0x4e   :  { %1064 = vmatprep.subr.bf16.mxu0 %v1099_v50 }
  0x51   :  { %1066 = vmatpush3.bf16.msra.mxu0 %v1065_v22 }
  0xf7   :  { %v765_v40 = vpop.f32.mrb[0].mxu0 }
  0xf8   :  { %v766_v42 = vpop.f32.mrb[1].mxu0 }
  0xf9   :  { %v800_v43 = vpop.f32.mrb[0].mxu1  ;;  %v767_v44 = vadd.f32 %v766_v42, %v765_v40 }
  0xfa   :  { %v801_v45 = vpop.f32.mrb[1].mxu1 }
  0xfb   :  { %v802_v46 = vadd.f32 %v801_v45, %v800_v43  ;;  %v216_v47 = vadd.f32 %v767_v44, %v725_v41 }
  0xfd   :  { %v286_v48 = vadd.f32 %v802_v46, %v216_v47  ;;  %v425_v49 = vpop.f32.mrb[2].mxu1 }
  0xfe   :  { %v874_v51 = vpop.f32.mrb[3].mxu1 }
 0x117   :  { %v835_v52 = vpop.f32.mrb[2].mxu0 }
 0x118   :  { %v836_v53 = vpop.f32.mrb[3].mxu0 }
 0x119   :  { %v837_v54 = vadd.f32 %v836_v53, %v835_v52 }
 0x11b   :  { %v356_v55 = vadd.f32 %v837_v54, %v286_v48 }
 0x11d   :  { %v426_v58 = vadd.f32 %v425_v49, %v356_v55 }
 0x11f   :  { %v429_v61 = vmax.f32 %v426_v58, 0.0 }
 0x121   :  { %892 = vmatmul.mubr.msk.f32.vlgmr.msra.gmra.mrb[4].mxu1 %vm445_vm2, %v429_v61 }
 0x122   :  { %1045 = vmatpush3.bf16.msra.mxu1 %v1044_v59  ;;  %910 = vmatprep.mubr.msk.f32.mxu1 %vm1100_vm0, %v1101_v60  ;;  %v526_v60 = vld [vmem:[%s1596_s5 + $0x30] sm:$0xff] }
 0x123   :  { %1046 = vmatprep.subr.bf16.mxu1 %v1099_v50  ;;  %v1053_v5 = vpack.c.bf16 %v527_v4, %v526_v60 }
 0x126   :  { %1048 = vmatpush3.bf16.msra.mxu1 %v1047_v0 }
 0x127   :  { %1049 = vmatprep.subr.bf16.mxu1 %v1099_v50 }
 0x12a   :  { %1051 = vmatpush3.bf16.msra.mxu1 %v1050_v3 }
 0x12b   :  { %1052 = vmatprep.subr.bf16.mxu1 %v1099_v50  ;;  %v729_v50 = vld [vmem:[%s1597_s6] ss:$0 sm:$0xff]  ;;  %s1102_s6 = smov [#allocation2]  }
 0x12c   :  { %s717_s7 = sshll.u32 %s1102_s6, 4  ;;  %s718_s7 = int_to_ptr.vmem [resolvable:$true] %s717_s7 }
 0x12d   :  { %s1075_s8 = scalar_lea.vmem %s718_s7, 128  ;;  %p1080_p1 = scmp.lt.s32.totalorder %s718_s7, %s718_s7 }
 0x12e   :  { %1054 = vmatpush3.bf16.msra.mxu1 %v1053_v5  ;;  %p1076_p0 = scmp.ne.s32.totalorder %s718_s7, %s1075_s8  ;;  %p1081_p2 = scmp.lt.s32.totalorder %s1075_s8, %s1075_s8 }
 0x130   :  { %p1082_p3 = por %p1081_p2, %p1080_p1 }
 0x132   :  { %p1083_p4 = pnand %p1082_p3, %p1076_p0 }
 0x1f4   :  { %v515_v16 = vpop.f32.mrb[4].mxu1 }
 0x1f5   :  { %v516_v17 = vadd.f32 %v727_v15, %v515_v16  ;;  %v893_v18 = vpop.f32.mrb[5].mxu1 }
 0x1f7   :  { %v519_v19 = vmax.f32 %v516_v17, 0.0 }
 0x1f9   :  { %911 = vmatmul.mubr.msk.f32.vlgmr.msra.gmra.mrb[6].mxu1 %vm445_vm2, %v519_v19 }
 0x2cc   :  { %v604_v23 = vpop.f32.mrb[6].mxu1 }
 0x2cd   :  { %v605_v24 = vadd.f32 %v729_v50, %v604_v23  ;;  %v912_v25 = vpop.f32.mrb[7].mxu1 }
 0x2cf   :  { %v608_v26 = vmax.f32 %v605_v24, 0.0 }
 0x2d1   :  { %930 = vmatmul.mubr.msk.f32.vlgmr.msra.gmra.mrb[4].mxu0 %vm445_vm2, %v608_v26 }
 0x3a4   :  { %v693_v28 = vpop.f32.mrb[4].mxu0 }
 0x3a5   :  { %v694_v29 = vadd.f32 %v731_v27, %v693_v28  ;;  %v931_v30 = vpop.f32.mrb[5].mxu0 }
 0x3a7   :  { %v698_v31 = vsel %vm697_vm3, %v694_v29, -inf }
 0x3a8   :  { %699 = vmax.xlane.f32.xlu0 %v698_v31 }
 0x435   :  { %v700_v32 = vpop.xlane.xlu0 %699 }
 0x436   :  { %v701_v33 = vsub.f32 %v694_v29, %v700_v32 }
 0x438   :  { %v702_v34 = vmul.f32 1.442695, %v701_v33 }
 0x43a   :  { %1071 = vpow2.f32 %v702_v34 }
 0x444   :  { %v1072_v35 = vpop.eup %1071 }
 0x445   :  { %v704_v36 = vsel %vm697_vm3, %v1072_v35, 0.0 }
 0x446   :  { %705 = vadd.xlane.f32.xlu0 %v704_v36 }
 0x4d3   :  { %v706_v37 = vpop.xlane.xlu0 %705 }
 0x4d4   :  { %1073 = vlog2.f32 %v706_v37 }
 0x4de   :  { %v1074_v38 = vpop.eup %1073 }
 0x4df   :  { %v708_v39 = vmul.f32 0.6931472, %v1074_v38 }
 0x4e1   :  { %v709_v40 = vsub.f32 %v701_v33, %v708_v39 }
 0x4e3   :  { %710 = vst.msk [vmem:[#allocation2] sm:$0xff] %vm697_vm3, %v709_v40 }
 0x4e4   :  { %1086 = shalt.err (!%p1083_p4)
}
 0x4e5   :  { %s1087_s0 = scalar_lea.hbm %s1600_s9, 128 }
 0x4e6   :  { %p1088_p5 = scmp.ne.s32.totalorder %s1600_s9, %s1087_s0  ;;  %p1091_p6 = scmp.lt.u32.totalorder %s1087_s0, %s1600_s9 }
 0x4e8   :  { %p1093_p7 = pnand %p1091_p6, %p1088_p5 }
 0x4ea   :  { %1096 = shalt.err (!%p1093_p7)
}
 0x4eb   :  { %720 = dma.vmem_to_hbm [thread:$0]  %s718_s7, 128, %s1600_s9, [#allocation3]  }
 0x4ec   :  { %1097 = dma.done.wait [#allocation3], 128  }
 0x4ed   :  { %1098 = vsyncadd [#allocation3], 4294967168 }
 0x4ee   :  { %724 = vsyncpa [#allocation3], 1 }

</bundles_post_ra>
